<compile_context>
chip_gen: v6e
topology: v6e:2x2x1
jax: 0.10.0
libtpu: 0.0.40
codegen_flags: <defaults>
</compile_context>

<pallas_src>
import functools

import jax
import jax.numpy as jnp
from jax.experimental import pallas as pl
from jax.experimental.pallas import tpu as pltpu


def _round_up(x, m):
    return (x + m - 1) // m * m


# ----------------------------------------------------------------------------
# Fused kernel: grid = (num_layers, num_row_tiles)
# ----------------------------------------------------------------------------
def _encoder_kernel(w_ref, b_ref, x_ref, a_ref, o_ref, h_ref, *extra,
                    row_tile, co_pad, a_resident):
    l = pl.program_id(0)             # layer index
    t = pl.program_id(1)             # A row-tile index
    num_layers = pl.num_programs(0)

    src = l % 2                      # layer-parity ping-pong over h buffers
    row0 = pl.multiple_of(t * row_tile, row_tile)

    # First grid step: stage x (and, if resident, A) from HBM into VMEM once.
    @pl.when(jnp.logical_and(l == 0, t == 0))
    def _init():
        pltpu.sync_copy(x_ref, h_ref.at[0])
        if a_resident:
            pltpu.sync_copy(a_ref, extra[0])

    if a_resident:
        a_tile = extra[0][pl.ds(row0, row_tile), :]      # slice resident A
    else:
        a_tile = a_ref[...]                              # streamed row tile

    # Reassociated (A_tile @ h) @ W_l  -- f32 accumulation on the MXU.
    ah = jnp.dot(a_tile, h_ref[src], preferred_element_type=jnp.float32)
    out_t = jnp.dot(ah.astype(jnp.bfloat16), w_ref[0],
                    preferred_element_type=jnp.float32) + b_ref[0]

    is_hidden = l < num_layers - 1

    # Hidden layers: ReLU, write rows into the *other* h buffer (bf16).
    @pl.when(jnp.logical_and(is_hidden, src == 0))
    def _hidden_even():
        h_ref[1, pl.ds(row0, row_tile), :] = jnp.maximum(
            out_t, 0.0).astype(h_ref.dtype)

    @pl.when(jnp.logical_and(is_hidden, src == 1))
    def _hidden_odd():
        h_ref[0, pl.ds(row0, row_tile), :] = jnp.maximum(
            out_t, 0.0).astype(h_ref.dtype)

    # Last layer: fused row-wise L1 normalization (torch F.normalize p=1).
    @pl.when(l == num_layers - 1)
    def _final():
        denom = jnp.maximum(
            jnp.sum(jnp.abs(out_t), axis=1, keepdims=True), 1e-12)
        o_ref[pl.ds(row0, row_tile), :] = (
            out_t[:, :co_pad] * pl.reciprocal(denom, approx=False)
        ).astype(o_ref.dtype)


# ----------------------------------------------------------------------------
# Wrapper: padding, bf16 cast, budget-driven tiling, single pallas_call
# ----------------------------------------------------------------------------
def encoder_fused(a, x, weights, biases, *, out_channels, force_stream_a=False):
    """a: [N, N], x: [N, Cin]; weights[i]: [cin_i, cout_i]; biases[i]: [cout_i]."""
    n = x.shape[0]
    num_layers = len(weights)

    # One lane-dense padded channel width shared by every layer.
    cmax = max([128, _round_up(x.shape[1], 128)]
               + [_round_up(w.shape[0], 128) for w in weights]
               + [_round_up(w.shape[1], 128) for w in weights])
    co_pad = _round_up(out_channels, 128)
    n_pad = _round_up(n, 128)

    # Row tile: >=256 when divisible (v6e/v7x 256x256 MXU), 512 for large N.
    if n_pad % 512 == 0 and n_pad >= 2048:
        row_tile = 512
    elif n_pad % 256 == 0:
        row_tile = 256
    else:
        row_tile = 128

    # VMEM budget: ~85% of physical (v5e/v6e ~108 MiB, v7x ~54 MiB).
    try:
        vmem_cap = pltpu.get_tpu_info().vmem_capacity_bytes
    except Exception:
        vmem_cap = 64 * 1024 * 1024                     # conservative fallback
    vmem_limit = int(vmem_cap * 0.85)
    budget = int(vmem_limit * 0.90)                      # headroom for internals

    bytes_h = 2 * n_pad * cmax * 2                       # bf16 ping-pong h
    bytes_out = n_pad * co_pad * 4                       # resident f32 output
    bytes_wb = 2 * (cmax * cmax * 2 + cmax * 4)          # double-buffered W + b
    fixed = bytes_h + bytes_out + bytes_wb

    a_resident = (not force_stream_a) and (fixed + n_pad * n_pad * 2 <= budget)
    if not a_resident:
        # Streaming path: shrink row_tile until the A-tile double buffer fits.
        while row_tile > 128 and fixed + 2 * row_tile * n_pad * 2 > budget:
            row_tile //= 2
        # TODO(synk): K-tile the A-column dimension for N too large even here.

    n_tiles = n_pad // row_tile

    # Zero padding keeps the L1 row sums and the real output rows exact.
    a_p = jnp.zeros((n_pad, n_pad), jnp.bfloat16).at[:n, :n].set(
        a.astype(jnp.bfloat16))
    x_p = jnp.zeros((n_pad, cmax), jnp.bfloat16).at[:n, :x.shape[1]].set(
        x.astype(jnp.bfloat16))
    w_stack = jnp.zeros((num_layers, cmax, cmax), jnp.bfloat16)
    b_stack = jnp.zeros((num_layers, 1, cmax), jnp.float32)
    for i, (w, b) in enumerate(zip(weights, biases)):
        w_stack = w_stack.at[i, :w.shape[0], :w.shape[1]].set(
            w.astype(jnp.bfloat16))
        b_stack = b_stack.at[i, 0, :b.shape[0]].set(b.astype(jnp.float32))

    kernel = functools.partial(_encoder_kernel, row_tile=row_tile,
                               co_pad=co_pad, a_resident=a_resident)

    in_specs = [
        pl.BlockSpec((1, cmax, cmax), lambda l, t: (l, 0, 0)),   # W_l
        pl.BlockSpec((1, 1, cmax), lambda l, t: (l, 0, 0)),      # b_l
        pl.BlockSpec(memory_space=pl.ANY),                       # x (HBM, copied once)
    ]
    if a_resident:
        in_specs.append(pl.BlockSpec(memory_space=pl.ANY))       # A (HBM, copied once)
    else:
        in_specs.append(pl.BlockSpec((row_tile, n_pad), lambda l, t: (t, 0)))

    scratch_shapes = [pltpu.VMEM((2, n_pad, cmax), jnp.bfloat16)]  # h ping-pong
    if a_resident:
        scratch_shapes.append(pltpu.VMEM((n_pad, n_pad), jnp.bfloat16))

    out_p = pl.pallas_call(
        kernel,
        out_shape=jax.ShapeDtypeStruct((n_pad, co_pad), jnp.float32),
        grid=(num_layers, n_tiles),
        in_specs=in_specs,
        # Output index never changes -> resident in VMEM, single HBM write.
        out_specs=pl.BlockSpec((n_pad, co_pad), lambda l, t: (0, 0)),
        scratch_shapes=scratch_shapes,
        compiler_params=pltpu.CompilerParams(
            dimension_semantics=("arbitrary", "arbitrary"),
            vmem_limit_bytes=vmem_limit),
    )(w_stack, b_stack, x_p, a_p)

    return out_p[:n, :out_channels]


# ----------------------------------------------------------------------------
# Encoder parameters + forward (mirrors the PyTorch module)
# ----------------------------------------------------------------------------
def init_encoder_params(key, in_channels, hidden_channels, out_channels):
    def glorot(k, fan_in, fan_out):
        limit = jnp.sqrt(6.0 / (fan_in + fan_out))
        return jax.random.uniform(k, (fan_in, fan_out), jnp.float32, -limit, limit)

    ks = jax.random.split(key, 10)
    return {
        "w1": glorot(ks[0], in_channels, hidden_channels),
        "b1": 0.1 * jax.random.normal(ks[5], (hidden_channels,), jnp.float32),
        "w2": glorot(ks[1], hidden_channels, hidden_channels),
        "b2": 0.1 * jax.random.normal(ks[6], (hidden_channels,), jnp.float32),
        "w3": glorot(ks[2], hidden_channels, hidden_channels),
        "b3": 0.1 * jax.random.normal(ks[7], (hidden_channels,), jnp.float32),
        "w0": glorot(ks[3], in_channels, out_channels),
        "b0": 0.1 * jax.random.normal(ks[8], (out_channels,), jnp.float32),
        "wl": glorot(ks[4], hidden_channels, out_channels),
        "bl": 0.1 * jax.random.normal(ks[9], (out_channels,), jnp.float32),
        # PReLU weight: defined in __init__ but unused in this forward path.
        "prelu": jnp.full((out_channels,), 0.25, jnp.float32),
    }


def encoder_forward(params, x, a, k=2, force_stream_a=False):
    """Mirrors Encoder.forward (activation=ReLU, dropout eval-mode)."""
    if k == 0:
        return encoder_fused(a, x, [params["w0"]], [params["b0"]],
                             out_channels=params["w0"].shape[1],
                             force_stream_a=force_stream_a)
    layer_keys = [("w1", "b1"), ("w2", "b2"), ("w3", "b3")][:k]
    weights = [params[wk] for wk, _ in layer_keys] + [params["wl"]]
    biases = [params[bk] for _, bk in layer_keys] + [params["bl"]]
    h = encoder_fused(a, x, weights, biases,
                      out_channels=params["wl"].shape[1],
                      force_stream_a=force_stream_a)
    return (h, h, a)


# ----------------------------------------------------------------------------
# Pure-JAX references
# ----------------------------------------------------------------------------
def encoder_reference(params, x, a, k=2, match_kernel=True):
    """match_kernel=True reproduces the kernel's bf16 / (A@h)@W numerics;
       match_kernel=False is the plain f32 torch math A@(h@W)."""
    def mm(p, q):
        if match_kernel:
            return jnp.dot(p.astype(jnp.bfloat16), q.astype(jnp.bfloat16),
                           preferred_element_type=jnp.float32)
        return jnp.dot(p, q, preferred_element_type=jnp.float32)

    if k == 0:
        names = [("w0", "b0", False)]
    else:
        names = ([("w1", "b1", True), ("w2", "b2", True), ("w3", "b3", True)][:k]
                 + [("wl", "bl", False)])
    h = x
    for wk, bk, relu in names:
        if match_kernel:
            out = mm(mm(a, h), params[wk]) + params[bk]
        else:
            out = mm(a, mm(h, params[wk])) + params[bk]
        if relu:
            out = jnp.maximum(out, 0.0)
            if match_kernel:
                out = out.astype(jnp.bfloat16)
        h = out
    h = h.astype(jnp.float32)
    denom = jnp.maximum(jnp.sum(jnp.abs(h), axis=1, keepdims=True), 1e-12)
    return h / denom


# ----------------------------------------------------------------------------
if __name__ == "__main__":
    key = jax.random.PRNGKey(0)
    k_x, k_a, k_p = jax.random.split(key, 3)

    N = 16        # nodes
    IN_C = 8      # in_channels
    HID_C = 32    # hidden_channels
    OUT_C = 16    # out_channels

    x = jax.random.normal(k_x, (N, IN_C), jnp.float32)
    a_raw = jax.random.uniform(k_a, (N, N), jnp.float32)
    a_sym = 0.5 * (a_raw + a_raw.T) + jnp.eye(N, dtype=jnp.float32)
    a = a_sym / jnp.sum(a_sym, axis=1, keepdims=True)

    params = init_encoder_params(k_p, IN_C, HID_C, OUT_C)

    fwd = jax.jit(functools.partial(encoder_forward, k=2))
    out, out_dup, a_out = fwd(params, x, a)
    jax.block_until_ready(out)

    ref_bf16 = encoder_reference(params, x, a, k=2, match_kernel=True)
    ref_f32 = encoder_reference(params, x, a, k=2, match_kernel=False)

    assert out.shape == (N, OUT_C), f"bad shape {out.shape}"
    assert jnp.allclose(out, ref_bf16, atol=2e-3, rtol=2e-3), (
        "mismatch vs bf16-matched reference: "
        f"max abs diff {float(jnp.max(jnp.abs(out - ref_bf16)))}")
    assert jnp.allclose(out, ref_f32, atol=5e-2, rtol=5e-2), (
        "mismatch vs f32 reference: "
        f"max abs diff {float(jnp.max(jnp.abs(out - ref_f32)))}")
    assert jnp.allclose(out, out_dup)
    assert jnp.allclose(a_out, a)

    # Also exercise the streaming-A fallback path (same numerics expected).
    out_s, _, _ = encoder_forward(params, x, a, k=2, force_stream_a=True)
    jax.block_until_ready(out_s)
    assert jnp.allclose(out_s, out, atol=2e-3, rtol=2e-3), (
        "streaming path mismatch: "
        f"max abs diff {float(jnp.max(jnp.abs(out_s - out)))}")

    print("KERNEL_OK")
</pallas_src>

<mosaic_0001>
module attributes {stable_mosaic.version = 11 : i64} {
  func.func @_encoder_kernel(%arg0: i32, %arg1: i32, %arg2: memref<1x128x128xbf16, #tpu.memory_space<vmem>>, %arg3: memref<1x1x128xf32, #tpu.memory_space<vmem>>, %arg4: memref<128x128xbf16, #tpu.memory_space<any>>, %arg5: memref<128x128xbf16, #tpu.memory_space<any>>, %arg6: memref<128x128xf32, #tpu.memory_space<vmem>>, %arg7: memref<2x128x128xbf16, #tpu.memory_space<vmem>>, %arg8: memref<128x128xbf16, #tpu.memory_space<vmem>>) attributes {dimension_semantics = [#tpu.dimension_semantics<arbitrary>, #tpu.dimension_semantics<arbitrary>], iteration_bounds = array<i64: 3, 1>, scalar_prefetch = 0 : i64, scratch_operands = 2 : i64, tpu.core_type = #tpu.core_type<tc>, window_params = [{transform_indices = @transform_0, window_bounds = array<i64: 1, 128, 128>}, {transform_indices = @transform_1, window_bounds = array<i64: 1, 1, 128>}, {}, {}, {pipeline_mode = #tpu.pipeline_mode<synchronous>, transform_indices = @transform_4, window_bounds = array<i64: 128, 128>}]} {
    %c2_i32 = arith.constant 2 : i32
    %c0_i32 = arith.constant 0 : i32
    %0 = arith.cmpi eq, %c2_i32, %c0_i32 : i32
    %c1_i32 = arith.constant 1 : i32
    %1 = arith.select %0, %c1_i32, %c2_i32 : i32
    %2 = arith.remsi %arg0, %1 : i32
    %c0_i32_0 = arith.constant 0 : i32
    %3 = arith.cmpi ne, %2, %c0_i32_0 : i32
    %c0_i32_1 = arith.constant 0 : i32
    %4 = arith.cmpi slt, %2, %c0_i32_1 : i32
    %c0_i32_2 = arith.constant 0 : i32
    %5 = arith.cmpi slt, %1, %c0_i32_2 : i32
    %6 = arith.xori %4, %5 : i1
    %7 = arith.andi %6, %3 : i1
    %8 = arith.addi %2, %1 : i32
    %9 = arith.select %7, %8, %2 : i32
    %c128_i32 = arith.constant 128 : i32
    %10 = arith.muli %arg1, %c128_i32 : i32
    %11 = tpu.assume_multiple %10, 128 : i32
    %c0_i32_3 = arith.constant 0 : i32
    %12 = arith.cmpi eq, %arg0, %c0_i32_3 : i32
    %c0_i32_4 = arith.constant 0 : i32
    %13 = arith.cmpi eq, %arg1, %c0_i32_4 : i32
    %14 = arith.andi %12, %13 : i1
    %15 = arith.extui %14 : i1 to i32
    %c0_i32_5 = arith.constant 0 : i32
    %16 = arith.cmpi ne, %15, %c0_i32_5 : i32
    scf.if %16 {
      %c0_i32_22 = arith.constant 0 : i32
      "tpu.region"() ({
        %43 = tpu.sem_alloc : memref<!tpu.dma_semaphore, #tpu.memory_space<semaphore_mem>>
        %c0_i32_23 = arith.constant 0 : i32
        %c0_i32_24 = arith.constant 0 : i32
        %44 = tpu.memref_slice %arg7[%c0_i32_22, %c0_i32_23, %c0_i32_24] : memref<2x128x128xbf16, #tpu.memory_space<vmem>> -> memref<1x128x128xbf16, #tpu.memory_space<vmem>>
        %45 = tpu.memref_squeeze %44 : memref<1x128x128xbf16, #tpu.memory_space<vmem>> -> memref<128x128xbf16, #tpu.memory_space<vmem>>
        tpu.enqueue_dma source(%arg4 : memref<128x128xbf16, #tpu.memory_space<any>>) target(%45 : memref<128x128xbf16, #tpu.memory_space<vmem>>) target_semaphore(%43 : memref<!tpu.dma_semaphore, #tpu.memory_space<semaphore_mem>>)
        %c0_i32_25 = arith.constant 0 : i32
        %c0_i32_26 = arith.constant 0 : i32
        %46 = tpu.memref_slice %arg7[%c0_i32_22, %c0_i32_25, %c0_i32_26] : memref<2x128x128xbf16, #tpu.memory_space<vmem>> -> memref<1x128x128xbf16, #tpu.memory_space<vmem>>
        %47 = tpu.memref_squeeze %46 : memref<1x128x128xbf16, #tpu.memory_space<vmem>> -> memref<128x128xbf16, #tpu.memory_space<vmem>>
        tpu.wait_dma2 semaphore(%43 : memref<!tpu.dma_semaphore, #tpu.memory_space<semaphore_mem>>) src(%arg4 : memref<128x128xbf16, #tpu.memory_space<any>>) dst(%47 : memref<128x128xbf16, #tpu.memory_space<vmem>>)
        tpu.yield
      }) : () -> ()
      "tpu.region"() ({
        %43 = tpu.sem_alloc : memref<!tpu.dma_semaphore, #tpu.memory_space<semaphore_mem>>
        tpu.enqueue_dma source(%arg5 : memref<128x128xbf16, #tpu.memory_space<any>>) target(%arg8 : memref<128x128xbf16, #tpu.memory_space<vmem>>) target_semaphore(%43 : memref<!tpu.dma_semaphore, #tpu.memory_space<semaphore_mem>>)
        tpu.wait_dma2 semaphore(%43 : memref<!tpu.dma_semaphore, #tpu.memory_space<semaphore_mem>>) src(%arg5 : memref<128x128xbf16, #tpu.memory_space<any>>) dst(%arg8 : memref<128x128xbf16, #tpu.memory_space<vmem>>)
        tpu.yield
      }) : () -> ()
    } else {
    }
    %17 = arith.index_cast %11 : i32 to index
    %c0 = arith.constant 0 : index
    %18 = vector.load %arg8[%17, %c0] : memref<128x128xbf16, #tpu.memory_space<vmem>>, vector<128x128xbf16>
    %19 = arith.index_cast %9 : i32 to index
    %c0_6 = arith.constant 0 : index
    %c0_7 = arith.constant 0 : index
    %20 = vector.load %arg7[%19, %c0_6, %c0_7] : memref<2x128x128xbf16, #tpu.memory_space<vmem>>, vector<1x128x128xbf16>
    %21 = vector.shape_cast %20 : vector<1x128x128xbf16> to vector<128x128xbf16>
    %cst = arith.constant dense<0.000000e+00> : vector<128x128xf32>
    %22 = tpu.matmul %18, %21, %cst {dimension_numbers = #tpu.dot_dimension_numbers<[1], [0], [0], [1], [0, 0, 1, 1], [], []>} : vector<128x128xbf16>, vector<128x128xbf16>, vector<128x128xf32> -> vector<128x128xf32>
    %23 = arith.truncf %22 : vector<128x128xf32> to vector<128x128xbf16>
    %c0_8 = arith.constant 0 : index
    %c0_9 = arith.constant 0 : index
    %c0_10 = arith.constant 0 : index
    %24 = vector.load %arg2[%c0_8, %c0_9, %c0_10] : memref<1x128x128xbf16, #tpu.memory_space<vmem>>, vector<1x128x128xbf16>
    %25 = vector.shape_cast %24 : vector<1x128x128xbf16> to vector<128x128xbf16>
    %cst_11 = arith.constant dense<0.000000e+00> : vector<128x128xf32>
    %26 = tpu.matmul %23, %25, %cst_11 {dimension_numbers = #tpu.dot_dimension_numbers<[1], [0], [0], [1], [0, 0, 1, 1], [], []>} : vector<128x128xbf16>, vector<128x128xbf16>, vector<128x128xf32> -> vector<128x128xf32>
    %c0_12 = arith.constant 0 : index
    %c0_13 = arith.constant 0 : index
    %c0_14 = arith.constant 0 : index
    %27 = vector.load %arg3[%c0_12, %c0_13, %c0_14] : memref<1x1x128xf32, #tpu.memory_space<vmem>>, vector<1x1x128xf32>
    %28 = vector.shape_cast %27 : vector<1x1x128xf32> to vector<1x128xf32>
    %29 = vector.broadcast %28 : vector<1x128xf32> to vector<128x128xf32>
    %30 = arith.addf %26, %29 : vector<128x128xf32>
    %c2_i32_15 = arith.constant 2 : i32
    %31 = arith.cmpi slt, %arg0, %c2_i32_15 : i32
    %c0_i32_16 = arith.constant 0 : i32
    %32 = arith.cmpi eq, %9, %c0_i32_16 : i32
    %33 = arith.andi %31, %32 : i1
    %34 = arith.extui %33 : i1 to i32
    %c0_i32_17 = arith.constant 0 : i32
    %35 = arith.cmpi ne, %34, %c0_i32_17 : i32
    scf.if %35 {
      %cst_22 = arith.constant 0.000000e+00 : f32
      %43 = vector.broadcast %cst_22 : f32 to vector<128x128xf32>
      %44 = arith.maximumf %30, %43 : vector<128x128xf32>
      %45 = arith.truncf %44 : vector<128x128xf32> to vector<128x128xbf16>
      %c1 = arith.constant 1 : index
      %46 = arith.index_cast %11 : i32 to index
      %c0_23 = arith.constant 0 : index
      %47 = vector.load %arg7[%c1, %46, %c0_23] : memref<2x128x128xbf16, #tpu.memory_space<vmem>>, vector<1x128x128xbf16>
      %48 = vector.shape_cast %47 : vector<1x128x128xbf16> to vector<128x128xbf16>
      %49 = vector.shape_cast %45 : vector<128x128xbf16> to vector<1x128x128xbf16>
      tpu.vector_store %arg7[%c1, %46, %c0_23], %49 {strides = array<i32>} : memref<2x128x128xbf16, #tpu.memory_space<vmem>>, vector<1x128x128xbf16>,
    } else {
    }
    %c1_i32_18 = arith.constant 1 : i32
    %36 = arith.cmpi eq, %9, %c1_i32_18 : i32
    %37 = arith.andi %31, %36 : i1
    %38 = arith.extui %37 : i1 to i32
    %c0_i32_19 = arith.constant 0 : i32
    %39 = arith.cmpi ne, %38, %c0_i32_19 : i32
    scf.if %39 {
      %cst_22 = arith.constant 0.000000e+00 : f32
      %43 = vector.broadcast %cst_22 : f32 to vector<128x128xf32>
      %44 = arith.maximumf %30, %43 : vector<128x128xf32>
      %45 = arith.truncf %44 : vector<128x128xf32> to vector<128x128xbf16>
      %c0_23 = arith.constant 0 : index
      %46 = arith.index_cast %11 : i32 to index
      %c0_24 = arith.constant 0 : index
      %47 = vector.load %arg7[%c0_23, %46, %c0_24] : memref<2x128x128xbf16, #tpu.memory_space<vmem>>, vector<1x128x128xbf16>
      %48 = vector.shape_cast %47 : vector<1x128x128xbf16> to vector<128x128xbf16>
      %49 = vector.shape_cast %45 : vector<128x128xbf16> to vector<1x128x128xbf16>
      tpu.vector_store %arg7[%c0_23, %46, %c0_24], %49 {strides = array<i32>} : memref<2x128x128xbf16, #tpu.memory_space<vmem>>, vector<1x128x128xbf16>,
    } else {
    }
    %c2_i32_20 = arith.constant 2 : i32
    %40 = arith.cmpi eq, %arg0, %c2_i32_20 : i32
    %41 = arith.extui %40 : i1 to i32
    %c0_i32_21 = arith.constant 0 : i32
    %42 = arith.cmpi ne, %41, %c0_i32_21 : i32
    scf.if %42 {
      %43 = math.absf %30 : vector<128x128xf32>
      %cst_22 = arith.constant dense<0.000000e+00> : vector<128xf32>
      %44 = vector.multi_reduction <add>, %43, %cst_22 [1] : vector<128x128xf32> to vector<128xf32>
      %45 = vector.shape_cast %44 : vector<128xf32> to vector<128x1xf32>
      %cst_23 = arith.constant 9.99999996E-13 : f32
      %46 = vector.broadcast %cst_23 : f32 to vector<128x1xf32>
      %47 = arith.maximumf %45, %46 : vector<128x1xf32>
      %48 = tpu.reciprocal %47 : vector<128x1xf32> -> vector<128x1xf32>
      %49 = vector.broadcast %48 : vector<128x1xf32> to vector<128x128xf32>
      %50 = arith.mulf %30, %49 : vector<128x128xf32>
      %51 = arith.index_cast %11 : i32 to index
      %c0_24 = arith.constant 0 : index
      %52 = vector.load %arg6[%51, %c0_24] : memref<128x128xf32, #tpu.memory_space<vmem>>, vector<128x128xf32>
      tpu.vector_store %arg6[%51, %c0_24], %50 {strides = array<i32>} : memref<128x128xf32, #tpu.memory_space<vmem>>, vector<128x128xf32>,
    } else {
    }
    return
  }
  func.func @transform_0(%arg0: i32, %arg1: i32) -> (i32, i32, i32) {
    %c0_i32 = arith.constant 0 : i32
    %c0_i32_0 = arith.constant 0 : i32
    %c0_i32_1 = arith.constant 0 : i32
    return %arg0, %c0_i32, %c0_i32_0 : i32, i32, i32
  }
  func.func @transform_1(%arg0: i32, %arg1: i32) -> (i32, i32, i32) {
    %c0_i32 = arith.constant 0 : i32
    %c0_i32_0 = arith.constant 0 : i32
    %c0_i32_1 = arith.constant 0 : i32
    return %arg0, %c0_i32, %c0_i32_0 : i32, i32, i32
  }
  func.func @transform_4(%arg0: i32, %arg1: i32) -> (i32, i32) {
    %c0_i32 = arith.constant 0 : i32
    %c0_i32_0 = arith.constant 0 : i32
    %c0_i32_1 = arith.constant 0 : i32
    return %c0_i32, %c0_i32_0 : i32, i32
  }
}

</mosaic_0001>

<bundles_post_ra>
// kernel: encoder_forward.1
= control target key start
LH: loop header
LB: loop body
LE: loop exit
PB: predicated region body
PF: predicated region fallthrough
CT: control target
= control target key end

     0   :  { %s1551_s15 = smov 0   ;;  %s1553_s16 = smov 0   ;;  %s1831_s0 = inlined_call_operand.vmem [shape: bf16[3,128,128], index: 0, kind: input, shape index: {}]   ;;  %s1832_s1 = inlined_call_operand.vmem [shape: f32[3,1,128], index: 1, kind: input, shape index: {}]   ;;  %s1833_s2 = inlined_call_operand.vmem [shape: bf16[128,128], index: 2, kind: input, shape index: {}]   ;;  %s1834_s3 = inlined_call_operand.vmem [shape: bf16[128,128], index: 3, kind: input, shape index: {}]   ;;  %s1835_s4 = inlined_call_operand.vmem [shape: f32[128,128], index: 4, kind: output, shape index: {}]  }
   0x1   :  { %s1555_s17 = smov 0  }
   0x2 LB: > { %s26_s18 = sadd.s32 1, %s1520_s16  ;;  %p1107_p0 = scmp.ge.s32.totalorder %s1524_s17, 1  ;;  %s1524_s17 = sphi %s1555_s17, %s14_s17   ;;  %s1520_s16 = sphi %s1553_s16, %s1838_s16   ;;  %s1516_s15 = sphi %s1551_s15, %s1837_s15  }
   0x3   : > { %p28_p1 = scmp.ge.s32.totalorder %s26_s18, 3  ;;  %p129_p2 = scmp.lt.s32.totalorder %s1524_s17, 4 }
   0x5   : > { %s1840_s18 = smov (%p28_p1, %s26_s18), 0  ;;  %p130_p3 = pnand %p1107_p0, %p129_p2 }
   0x6   : > { %p149_p4 = scmp.lt.s32.totalorder (!%p130_p3), %s1516_s15, 2  ;;  %s159_s19 = ssub.s32 (!%p130_p3), 0, %s1516_s15 }
   0x7   : > { %133 = sbr.rel (%p130_p3) target bundleno = 719 (0x2cf), region = 28  ;;  %p171_p5 = scmp.eq.s32.totalorder (!%p130_p3), %s1516_s15, 0 }
   0x8   : > { %p158_p6 = scmp.lt.s32.totalorder (!%p130_p3), %s1516_s15, 0  ;;  %s1110_s21 = smin.u32 (!%p130_p3), %s1516_s15, %s159_s19 }
   0x9   : > { %s161_s29 = sand.u32 (!%p130_p3), 1, %s1110_s21  }
   0xa   : > { %s162_s30 = ssub.s32 (!%p130_p3), 0, %s161_s29 }
   0xc   : > { %s1577_s20 = scalar_select %p149_p4, %s1516_s15, 2 }
   0xd   : > { %s1842_s30 = smov (!%p158_p6, %s162_s30), %s161_s29  ;;  %176 = sbr.rel (!%p171_p5) target bundleno = 34 (0x22), region = 32 }
   0xe   : > { %s1192_s22 = sshll.u32 %s1577_s20, 6  ;;  %s156_s25 = scalar_lea.vmem %s1832_s1, %s1577_s20 }
   0xf   : > { %s1589_s28 = scalar_lea.vmem %s1831_s0, %s1192_s22  ;;  %p1112_p7 = scmp.lt.s32.totalorder %s1842_s30, 0 }
  0x10   : > { %s168_s5 = sadd.s32 2, %s1842_s30 }
  0x11   : > { %s1844_s5 = smov (!%p1112_p7, %s168_s5), %s1842_s30 }
  0x12   : > { %v210_v0 = vld [vmem:[%s1833_s2] sm:$0xff]  ;;  %v212_v1 = vld [vmem:[%s1833_s2 + $0x8] sm:$0xff]  ;;  %v214_v2 = vld [vmem:[%s1833_s2 + $0x10] sm:$0xff] }
  0x13   : > { %211 = vst [vmem:[#allocation2] sm:$0xff] %v210_v0  ;;  %213 = vst [vmem:[#allocation2 + $0x8] sm:$0xff] %v212_v1  ;;  %v216_v3 = vld [vmem:[%s1833_s2 + $0x18] sm:$0xff]  ;;  %v218_v4 = vld [vmem:[%s1833_s2 + $0x20] sm:$0xff] }
  0x14   : > { %215 = vst [vmem:[#allocation2 + $0x10] sm:$0xff] %v214_v2  ;;  %v220_v5 = vld [vmem:[%s1833_s2 + $0x28] sm:$0xff]  ;;  %217 = vst [vmem:[#allocation2 + $0x18] sm:$0xff] %v216_v3  ;;  %v222_v6 = vld [vmem:[%s1833_s2 + $0x30] sm:$0xff] }
  0x15   : > { %219 = vst [vmem:[#allocation2 + $0x20] sm:$0xff] %v218_v4  ;;  %221 = vst [vmem:[#allocation2 + $0x28] sm:$0xff] %v220_v5  ;;  %v224_v7 = vld [vmem:[%s1833_s2 + $0x38] sm:$0xff] }
  0x16   : > { %223 = vst [vmem:[#allocation2 + $0x30] sm:$0xff] %v222_v6  ;;  %225 = vst [vmem:[#allocation2 + $0x38] sm:$0xff] %v224_v7 }
  0x17   : > { %233 = vsyncadd [#allocation4], 1024 }
  0x18   : > { %1510 = dma.done.wait [#allocation4], 1024 }
  0x19   : > { %1511 = vsyncadd [#allocation4], 4294966272 }
  0x1a   : > { %v271_v8 = vld [vmem:[%s1834_s3] sm:$0xff]  ;;  %v273_v9 = vld [vmem:[%s1834_s3 + $0x8] sm:$0xff]  ;;  %v275_v10 = vld [vmem:[%s1834_s3 + $0x10] sm:$0xff] }
  0x1b   : > { %272 = vst [vmem:[#allocation3] sm:$0xff] %v271_v8  ;;  %274 = vst [vmem:[#allocation3 + $0x8] sm:$0xff] %v273_v9  ;;  %v277_v11 = vld [vmem:[%s1834_s3 + $0x18] sm:$0xff]  ;;  %v279_v12 = vld [vmem:[%s1834_s3 + $0x20] sm:$0xff] }
  0x1c   : > { %276 = vst [vmem:[#allocation3 + $0x10] sm:$0xff] %v275_v10  ;;  %v281_v13 = vld [vmem:[%s1834_s3 + $0x28] sm:$0xff]  ;;  %278 = vst [vmem:[#allocation3 + $0x18] sm:$0xff] %v277_v11  ;;  %v283_v14 = vld [vmem:[%s1834_s3 + $0x30] sm:$0xff] }
  0x1d   : > { %280 = vst [vmem:[#allocation3 + $0x20] sm:$0xff] %v279_v12  ;;  %282 = vst [vmem:[#allocation3 + $0x28] sm:$0xff] %v281_v13  ;;  %v285_v15 = vld [vmem:[%s1834_s3 + $0x38] sm:$0xff] }
  0x1e   : > { %284 = vst [vmem:[#allocation3 + $0x30] sm:$0xff] %v283_v14  ;;  %286 = vst [vmem:[#allocation3 + $0x38] sm:$0xff] %v285_v15 }
  0x1f   : > { %294 = vsyncadd [#allocation6], 1024 }
  0x20   : > { %1512 = dma.done.wait [#allocation6], 1024 }
  0x21   : > { %1513 = vsyncadd [#allocation6], 4294966272 }
  0x22 PF: > { %s1194_s26 = sshll.u32 %s1844_s5, 6  ;;  %v1450_v16 = vld [vmem:[#allocation3] sm:$0xff]   ;;  %v1458_v22 = vld [vmem:[%s1589_s28 + $0x38] sm:$0xff]   ;;  %v1459_v23 = vld [vmem:[%s1589_s28 + $0x30] sm:$0xff]   ;;  %p708_p8 = scmp.eq.s32.totalorder %s1844_s5, 0 }
  0x23   : > { %s1642_s27 = scalar_lea.vmem [#allocation2], %s1194_s26  ;;  %1370 = vmatprep.mubr.bf16.mxu0 %v1450_v16  ;;  %1386 = vmatprep.subr.bf16.mxu1 %v1458_v22  ;;  %v1460_v25 = vld [vmem:[%s1589_s28 + $0x28] sm:$0xff]   ;;  %v1461_v27 = vld [vmem:[%s1589_s28 + $0x20] sm:$0xff]   ;;  %v1462_v29 = vld [vmem:[%s1589_s28 + $0x18] sm:$0xff]  }
  0x24   : > { %v1442_v17 = vld [vmem:[%s1642_s27 + $0x38] sm:$0xff]   ;;  %v1443_v18 = vld [vmem:[%s1642_s27 + $0x30] sm:$0xff]   ;;  %v1444_v19 = vld [vmem:[%s1642_s27 + $0x28] sm:$0xff]   ;;  %1387 = vmatpush3.bf16.msra.mxu1 %v1458_v22  ;;  %p1663_p9 = pnand %p708_p8, %p149_p4 }
  0x25   : > { %1354 = vmatprep.subr.bf16.mxu0 %v1442_v17  ;;  %v1445_v20 = vld [vmem:[%s1642_s27 + $0x20] sm:$0xff]   ;;  %v1446_v21 = vld [vmem:[%s1642_s27 + $0x18] sm:$0xff]   ;;  %v1447_v24 = vld [vmem:[%s1642_s27 + $0x10] sm:$0xff]   ;;  %1388 = vmatprep.subr.bf16.mxu1 %v1459_v23 }
  0x26   : > { %1355 = vmatpush3.bf16.msra.mxu0 %v1442_v17  ;;  %v1448_v26 = vld [vmem:[%s1642_s27 + $0x8] sm:$0xff]   ;;  %v1449_v28 = vld [vmem:[%s1642_s27] sm:$0xff]   ;;  %v1463_v31 = vld [vmem:[%s1589_s28 + $0x10] sm:$0xff]  }
  0x27   : > { %1356 = vmatprep.subr.bf16.mxu0 %v1443_v18  ;;  %v1451_v30 = vld [vmem:[#allocation3 + $0x8] sm:$0xff]   ;;  %v1452_v32 = vld [vmem:[#allocation3 + $0x10] sm:$0xff]   ;;  %v1453_v33 = vld [vmem:[#allocation3 + $0x18] sm:$0xff]  }
  0x28   : > { %1389 = vmatpush3.bf16.msra.mxu1 %v1459_v23  ;;  %v1454_v34 = vld [vmem:[#allocation3 + $0x20] sm:$0xff]   ;;  %v1455_v35 = vld [vmem:[#allocation3 + $0x28] sm:$0xff]   ;;  %v1456_v36 = vld [vmem:[#allocation3 + $0x30] sm:$0xff]  }
  0x29   : > { %1390 = vmatprep.subr.bf16.mxu1 %v1460_v25  ;;  %v1457_v37 = vld [vmem:[#allocation3 + $0x38] sm:$0xff]   ;;  %v1464_v38 = vld [vmem:[%s1589_s28 + $0x8] sm:$0xff]   ;;  %v1465_v39 = vld [vmem:[%s1589_s28] sm:$0xff]  }
  0x2a   : > { %1357 = vmatpush3.bf16.msra.mxu0 %v1443_v18  ;;  %v1132_v0 = vld [vmem:[%s156_s25] ss:$0 sm:$0xff] }
  0x2b   : > { %1358 = vmatprep.subr.bf16.mxu0 %v1444_v19 }
  0x2c   : > { %1391 = vmatpush3.bf16.msra.mxu1 %v1460_v25 }
  0x2d   : > { %1392 = vmatprep.subr.bf16.mxu1 %v1461_v27 }
  0x2e   : > { %1359 = vmatpush3.bf16.msra.mxu0 %v1444_v19 }
  0x2f   : > { %1360 = vmatprep.subr.bf16.mxu0 %v1445_v20 }
  0x30   : > { %1393 = vmatpush3.bf16.msra.mxu1 %v1461_v27 }
  0x31   : > { %1394 = vmatprep.subr.bf16.mxu1 %v1462_v29 }
  0x32   : > { %1361 = vmatpush3.bf16.msra.mxu0 %v1445_v20 }
  0x33   : > { %1362 = vmatprep.subr.bf16.mxu0 %v1446_v21 }
  0x34   : > { %1395 = vmatpush3.bf16.msra.mxu1 %v1462_v29 }
  0x35   : > { %1396 = vmatprep.subr.bf16.mxu1 %v1463_v31 }
  0x36   : > { %1363 = vmatpush3.bf16.msra.mxu0 %v1446_v21 }
  0x37   : > { %1364 = vmatprep.subr.bf16.mxu0 %v1447_v24 }
  0x38   : > { %1397 = vmatpush3.bf16.msra.mxu1 %v1463_v31 }
  0x39   : > { %1398 = vmatprep.subr.bf16.mxu1 %v1464_v38 }
  0x3a   : > { %1365 = vmatpush3.bf16.msra.mxu0 %v1447_v24 }
  0x3b   : > { %1366 = vmatprep.subr.bf16.mxu0 %v1448_v26 }
  0x3c   : > { %1399 = vmatpush3.bf16.msra.mxu1 %v1464_v38 }
  0x3d   : > { %1400 = vmatprep.subr.bf16.mxu1 %v1465_v39 }
  0x3e   : > { %1367 = vmatpush3.bf16.msra.mxu0 %v1448_v26 }
  0x3f   : > { %1368 = vmatprep.subr.bf16.mxu0 %v1449_v28 }
  0x40   : > { %1401 = vmatpush3.bf16.msra.mxu1 %v1465_v39 }
  0x42   : > { %1369 = vmatpush3.bf16.msra.mxu0 %v1449_v28 }
  0x45   : > { %1371 = vmatmul.mubr.bf16.vlgmr.msra.gmra.mxu0 %v1451_v30 }
  0x46   : > { %1374 = vmatprep.mubr.bf16.mxu0 %v1452_v32 }
  0x4d   : > { %1375 = vmatmul.mubr.bf16.gmra.mxu0 %v1453_v33 }
  0x4e   : > { %1378 = vmatprep.mubr.bf16.mxu0 %v1454_v34 }
  0x55   : > { %1379 = vmatmul.mubr.bf16.gmra.mxu0 %v1455_v35 }
  0x56   : > { %1382 = vmatprep.mubr.bf16.mxu0 %v1456_v36 }
  0x5d   : > { %1383 = vmatmul.mubr.bf16.gmra.mxu0 %v1457_v37 }
 0x105   : > { %v1372_v40 = vpop.f32.mrf.mxu0 }
 0x107   : > { %v468_v41 = vpop.f32.mrf.mxu0 }
 0x109   : > { %v1373_v42 = vpop.f32.mrf.mxu0 }
 0x10a   : > { %v532_v45 = vpack.c.bf16 %v1373_v42, %v1372_v40 }
 0x10b   : > { %v471_v43 = vpop.f32.mrf.mxu0 }
 0x10c   : > { %v531_v44 = vpack.c.bf16 %v471_v43, %v468_v41 }
 0x10d   : > { %v1376_v46 = vpop.f32.mrf.mxu0 }
 0x10e   : > { %1402 = vmatprep.mubr.bf16.mxu1 %v531_v44 }
 0x10f   : > { %v484_v47 = vpop.f32.mrf.mxu0  ;;  %1403 = vmatmul.mubr.bf16.vlgmr.msra.gmra.mxu1 %v532_v45 }
 0x111   : > { %v1377_v48 = vpop.f32.mrf.mxu0 }
 0x112   : > { %v534_v51 = vpack.c.bf16 %v1377_v48, %v1376_v46 }
 0x113   : > { %v487_v49 = vpop.f32.mrf.mxu0 }
 0x114   : > { %v533_v50 = vpack.c.bf16 %v487_v49, %v484_v47 }
 0x115   : > { %v1380_v52 = vpop.f32.mrf.mxu0 }
 0x116   : > { %1406 = vmatprep.mubr.bf16.mxu1 %v533_v50 }
 0x117   : > { %v500_v53 = vpop.f32.mrf.mxu0  ;;  %1407 = vmatmul.mubr.bf16.gmra.mxu1 %v534_v51 }
 0x119   : > { %v1381_v54 = vpop.f32.mrf.mxu0 }
 0x11a   : > { %v536_v57 = vpack.c.bf16 %v1381_v54, %v1380_v52 }
 0x11b   : > { %v503_v55 = vpop.f32.mrf.mxu0 }
 0x11c   : > { %v535_v56 = vpack.c.bf16 %v503_v55, %v500_v53 }
 0x11d   : > { %v1384_v58 = vpop.f32.mrf.mxu0 }
 0x11e   : > { %1410 = vmatprep.mubr.bf16.mxu1 %v535_v56 }
 0x11f   : > { %v516_v59 = vpop.f32.mrf.mxu0  ;;  %1411 = vmatmul.mubr.bf16.gmra.mxu1 %v536_v57 }
 0x121   : > { %v1385_v60 = vpop.f32.mrf.mxu0 }
 0x122   : > { %v538_v63 = vpack.c.bf16 %v1385_v60, %v1384_v58 }
 0x123   : > { %v519_v61 = vpop.f32.mrf.mxu0 }
 0x124   : > { %v537_v62 = vpack.c.bf16 %v519_v61, %v516_v59 }
 0x126   : > { %1414 = vmatprep.mubr.bf16.mxu1 %v537_v62 }
 0x127   : > { %1415 = vmatmul.mubr.bf16.gmra.mxu1 %v538_v63 }
 0x1cf   : > { %v1404_v1 = vpop.f32.mrf.mxu1 }
 0x1d0   : > { %v1672_v2 = vadd.f32 %v1404_v1, %v1132_v0 }
 0x1d1   : > { %v644_v3 = vpop.f32.mrf.mxu1 }
 0x1d2   : > { %v1674_v4 = vadd.f32 %v1132_v0, %v644_v3 }
 0x1d3   : > { %v1405_v5 = vpop.f32.mrf.mxu1 }
 0x1d4   : > { %v1676_v6 = vadd.f32 %v1405_v5, %v1132_v0 }
 0x1d5   : > { %v647_v7 = vpop.f32.mrf.mxu1 }
 0x1d6   : > { %v1678_v8 = vadd.f32 %v1132_v0, %v647_v7 }
 0x1d7   : > { %v1408_v9 = vpop.f32.mrf.mxu1 }
 0x1d8   : > { %v1680_v10 = vadd.f32 %v1408_v9, %v1132_v0 }
 0x1d9   : > { %v660_v11 = vpop.f32.mrf.mxu1 }
 0x1da   : > { %v1682_v12 = vadd.f32 %v1132_v0, %v660_v11 }
 0x1db   : > { %v1409_v13 = vpop.f32.mrf.mxu1 }
 0x1dc   : > { %v1684_v14 = vadd.f32 %v1409_v13, %v1132_v0 }
 0x1dd   : > { %v663_v15 = vpop.f32.mrf.mxu1 }
 0x1de   : > { %v1686_v16 = vadd.f32 %v1132_v0, %v663_v15 }
 0x1df   : > { %v1412_v17 = vpop.f32.mrf.mxu1 }
 0x1e0   : > { %v1688_v18 = vadd.f32 %v1412_v17, %v1132_v0 }
 0x1e1   : > { %v676_v19 = vpop.f32.mrf.mxu1 }
 0x1e2   : > { %v1690_v20 = vadd.f32 %v1132_v0, %v676_v19 }
 0x1e3   : > { %v1413_v21 = vpop.f32.mrf.mxu1 }
 0x1e4   : > { %v1692_v22 = vadd.f32 %v1413_v21, %v1132_v0 }
 0x1e5   : > { %v679_v23 = vpop.f32.mrf.mxu1 }
 0x1e6   : > { %v1694_v24 = vadd.f32 %v1132_v0, %v679_v23 }
 0x1e7   : > { %v1416_v25 = vpop.f32.mrf.mxu1 }
 0x1e8   : > { %v1696_v26 = vadd.f32 %v1416_v25, %v1132_v0 }
 0x1e9   : > { %v692_v27 = vpop.f32.mrf.mxu1 }
 0x1ea   : > { %v1698_v28 = vadd.f32 %v1132_v0, %v692_v27  ;;  %712 = sbr.rel (%p1663_p9) target bundleno = 505 (0x1f9), region = 106 }
 0x1eb   : > { %v1417_v29 = vpop.f32.mrf.mxu1 }
 0x1ec   : > { %v1700_v30 = vadd.f32 %v1417_v29, %v1132_v0 }
 0x1ed   : > { %v695_v31 = vpop.f32.mrf.mxu1 }
 0x1ee   : > { %v1702_v32 = vadd.f32 %v1132_v0, %v695_v31 }
 0x1ef   : > { %v713_v33 = vmax.f32 %v1674_v4, 0.0  ;;  %v714_v34 = vmax.f32 %v1678_v8, 0.0  ;;  %v715_v35 = vmax.f32 %v1672_v2, 0.0  ;;  %v716_v36 = vmax.f32 %v1676_v6, 0.0 }
 0x1f0   : > { %v717_v37 = vmax.f32 %v1682_v12, 0.0  ;;  %v718_v38 = vmax.f32 %v1686_v16, 0.0  ;;  %v719_v39 = vmax.f32 %v1680_v10, 0.0  ;;  %v720_v40 = vmax.f32 %v1684_v14, 0.0 }
 0x1f1   : > { %v1230_v41 = vpack.c.bf16 %v714_v34, %v713_v33  ;;  %v1235_v42 = vpack.c.bf16 %v716_v36, %v715_v35  ;;  %v721_v43 = vmax.f32 %v1690_v20, 0.0  ;;  %v722_v44 = vmax.f32 %v1694_v24, 0.0 }
 0x1f2   : > { %v1240_v45 = vpack.c.bf16 %v718_v38, %v717_v37  ;;  %v1245_v46 = vpack.c.bf16 %v720_v40, %v719_v39  ;;  %v723_v47 = vmax.f32 %v1688_v18, 0.0  ;;  %v724_v48 = vmax.f32 %v1692_v22, 0.0 }
 0x1f3   : > { %1307 = vst [vmem:[#allocation2 + $0x40] sm:$0xff] %v1230_v41   ;;  %1308 = vst [vmem:[#allocation2 + $0x48] sm:$0xff] %v1235_v42   ;;  %v1250_v49 = vpack.c.bf16 %v722_v44, %v721_v43  ;;  %v725_v50 = vmax.f32 %v1698_v28, 0.0  ;;  %v726_v51 = vmax.f32 %v1702_v32, 0.0  ;;  %v727_v52 = vmax.f32 %v1696_v26, 0.0 }
 0x1f4   : > { %1309 = vst [vmem:[#allocation2 + $0x50] sm:$0xff] %v1240_v45   ;;  %1310 = vst [vmem:[#allocation2 + $0x58] sm:$0xff] %v1245_v46   ;;  %v1255_v53 = vpack.c.bf16 %v724_v48, %v723_v47  ;;  %v728_v54 = vmax.f32 %v1700_v30, 0.0 }
 0x1f5   : > { %1311 = vst [vmem:[#allocation2 + $0x60] sm:$0xff] %v1250_v49   ;;  %v1260_v55 = vpack.c.bf16 %v726_v51, %v725_v50 }
 0x1f6   : > { %1312 = vst [vmem:[#allocation2 + $0x68] sm:$0xff] %v1255_v53   ;;  %v1265_v56 = vpack.c.bf16 %v728_v54, %v727_v52 }
 0x1f7   : > { %1313 = vst [vmem:[#allocation2 + $0x70] sm:$0xff] %v1260_v55  }
 0x1f8   : > { %1314 = vst [vmem:[#allocation2 + $0x78] sm:$0xff] %v1265_v56  }
 0x1f9 PF: > { %p812_p10 = scmp.eq.s32.totalorder %s1844_s5, 1 }
 0x1fb   : > { %p813_p11 = pnand %p812_p10, %p149_p4 }
 0x1fd   : > { %816 = sbr.rel (%p813_p11) target bundleno = 524 (0x20c), region = 110 }
 0x202   : > { %v817_v57 = vmax.f32 %v1674_v4, 0.0  ;;  %v818_v58 = vmax.f32 %v1678_v8, 0.0  ;;  %v819_v59 = vmax.f32 %v1672_v2, 0.0  ;;  %v820_v60 = vmax.f32 %v1676_v6, 0.0 }
 0x203   : > { %v821_v61 = vmax.f32 %v1682_v12, 0.0  ;;  %v822_v62 = vmax.f32 %v1686_v16, 0.0  ;;  %v823_v63 = vmax.f32 %v1680_v10, 0.0  ;;  %v824_v0 = vmax.f32 %v1684_v14, 0.0 }
 0x204   : > { %v1270_v1 = vpack.c.bf16 %v818_v58, %v817_v57  ;;  %v1275_v3 = vpack.c.bf16 %v820_v60, %v819_v59  ;;  %v825_v5 = vmax.f32 %v1690_v20, 0.0  ;;  %v826_v7 = vmax.f32 %v1694_v24, 0.0 }
 0x205   : > { %v1280_v9 = vpack.c.bf16 %v822_v62, %v821_v61  ;;  %v1285_v11 = vpack.c.bf16 %v824_v0, %v823_v63  ;;  %v827_v13 = vmax.f32 %v1688_v18, 0.0  ;;  %v828_v15 = vmax.f32 %v1692_v22, 0.0 }
 0x206   : > { %1271 = vst [vmem:[#allocation2] sm:$0xff] %v1270_v1   ;;  %1315 = vst [vmem:[#allocation2 + $0x8] sm:$0xff] %v1275_v3   ;;  %v1290_v17 = vpack.c.bf16 %v826_v7, %v825_v5  ;;  %v829_v19 = vmax.f32 %v1698_v28, 0.0  ;;  %v830_v21 = vmax.f32 %v1702_v32, 0.0  ;;  %v831_v23 = vmax.f32 %v1696_v26, 0.0 }
 0x207   : > { %1316 = vst [vmem:[#allocation2 + $0x10] sm:$0xff] %v1280_v9   ;;  %1317 = vst [vmem:[#allocation2 + $0x18] sm:$0xff] %v1285_v11   ;;  %v1295_v25 = vpack.c.bf16 %v828_v15, %v827_v13  ;;  %v832_v27 = vmax.f32 %v1700_v30, 0.0 }
 0x208   : > { %1318 = vst [vmem:[#allocation2 + $0x20] sm:$0xff] %v1290_v17   ;;  %v1300_v29 = vpack.c.bf16 %v830_v21, %v829_v19 }
 0x209   : > { %1319 = vst [vmem:[#allocation2 + $0x28] sm:$0xff] %v1295_v25   ;;  %v1305_v31 = vpack.c.bf16 %v832_v27, %v831_v23 }
 0x20a   : > { %1320 = vst [vmem:[#allocation2 + $0x30] sm:$0xff] %v1300_v29  }
 0x20b   : > { %1321 = vst [vmem:[#allocation2 + $0x38] sm:$0xff] %v1305_v31  }
 0x20c PF: > { %p1189_p12 = scmp.ne.s32.totalorder %s1516_s15, 2 }
 0x20e   : > { %918 = sbr.rel (%p1189_p12) target bundleno = 719 (0x2cf), region = 114 }
 0x213   : > { %v921_v33 = vand.u32 2147483647, %v1672_v2  ;;  %v919_v34 = vand.u32 2147483647, %v1674_v4  ;;  %v922_v35 = vand.u32 2147483647, %v1676_v6 }
 0x214   : > { %v920_v36 = vand.u32 2147483647, %v1678_v8  ;;  %v924_v37 = vand.u32 2147483647, %v1686_v16  ;;  %v923_v38 = vand.u32 2147483647, %v1682_v12 }
 0x215   : > { %939 = vadd.xlane.f32.xlu1 %v921_v33  ;;  %935 = vadd.xlane.f32.xlu0 %v919_v34  ;;  %v926_v39 = vand.u32 2147483647, %v1684_v14  ;;  %v925_v40 = vand.u32 2147483647, %v1680_v10  ;;  %v928_v41 = vand.u32 2147483647, %v1694_v24 }
 0x216   : > { %v927_v42 = vand.u32 2147483647, %v1690_v20  ;;  %v930_v43 = vand.u32 2147483647, %v1692_v22  ;;  %v929_v44 = vand.u32 2147483647, %v1688_v18 }
 0x217   : > { %v932_v45 = vand.u32 2147483647, %v1702_v32  ;;  %v931_v46 = vand.u32 2147483647, %v1698_v28  ;;  %v934_v47 = vand.u32 2147483647, %v1700_v30 }
 0x218   : > { %v933_v48 = vand.u32 2147483647, %v1696_v26 }
 0x219   : > { %941 = vadd.xlane.f32.xlu1 %v922_v35  ;;  %937 = vadd.xlane.f32.xlu0 %v920_v36 }
 0x21d   : > { %945 = vadd.xlane.f32.xlu1 %v924_v37  ;;  %943 = vadd.xlane.f32.xlu0 %v923_v38 }
 0x221   : > { %949 = vadd.xlane.f32.xlu1 %v926_v39  ;;  %947 = vadd.xlane.f32.xlu0 %v925_v40 }
 0x225   : > { %953 = vadd.xlane.f32.xlu1 %v928_v41  ;;  %951 = vadd.xlane.f32.xlu0 %v927_v42 }
 0x229   : > { %957 = vadd.xlane.f32.xlu1 %v930_v43  ;;  %955 = vadd.xlane.f32.xlu0 %v929_v44 }
 0x22d   : > { %961 = vadd.xlane.f32.xlu1 %v932_v45  ;;  %959 = vadd.xlane.f32.xlu0 %v931_v46 }
 0x231   : > { %965 = vadd.xlane.f32.xlu1 %v934_v47  ;;  %963 = vadd.xlane.f32.xlu0 %v933_v48 }
 0x29e   : > { %v940_v49 = vpop.xlane.xlu1 %939  ;;  %v936_v50 = vpop.xlane.xlu0 %935 }
 0x29f   : > { %v969_v51 = vmax.f32 %v940_v49, 1e-12  ;;  %v967_v52 = vmax.f32 %v936_v50, 1e-12 }
 0x2a1   : > { %1466 = vrcp.f32 %v969_v51 }
 0x2a2   : > { %1468 = vrcp.f32 %v967_v52  ;;  %v942_v53 = vpop.xlane.xlu1 %941  ;;  %v938_v54 = vpop.xlane.xlu0 %937 }
 0x2a3   : > { %v970_v55 = vmax.f32 %v942_v53, 1e-12  ;;  %v968_v56 = vmax.f32 %v938_v54, 1e-12 }
 0x2a5   : > { %1470 = vrcp.f32 %v970_v55 }
 0x2a6   : > { %1472 = vrcp.f32 %v968_v56  ;;  %v946_v57 = vpop.xlane.xlu1 %945  ;;  %v944_v58 = vpop.xlane.xlu0 %943 }
 0x2a7   : > { %v972_v59 = vmax.f32 %v946_v57, 1e-12  ;;  %v971_v60 = vmax.f32 %v944_v58, 1e-12 }
 0x2a9   : > { %1474 = vrcp.f32 %v972_v59 }
 0x2aa   : > { %1476 = vrcp.f32 %v971_v60  ;;  %v950_v61 = vpop.xlane.xlu1 %949  ;;  %v948_v62 = vpop.xlane.xlu0 %947 }
 0x2ab   : > { %v974_v63 = vmax.f32 %v950_v61, 1e-12  ;;  %v973_v0 = vmax.f32 %v948_v62, 1e-12 }
 0x2ad   : > { %1478 = vrcp.f32 %v974_v63 }
 0x2ae   : > { %v1467_v1 = vpop.eup %1466  ;;  %1480 = vrcp.f32 %v973_v0  ;;  %v954_v3 = vpop.xlane.xlu1 %953 }
 0x2af   : > { %v952_v5 = vpop.xlane.xlu0 %951  ;;  %v1469_v7 = vpop.eup %1468  ;;  %v1001_v9 = vmul.f32 %v1467_v1, %v1672_v2  ;;  %v976_v11 = vmax.f32 %v954_v3, 1e-12 }
 0x2b0   : > { %v975_v13 = vmax.f32 %v952_v5, 1e-12  ;;  %v999_v15 = vmul.f32 %v1469_v7, %v1674_v4 }
 0x2b1   : > { %1018 = vst [vmem:[%s1835_s4 + $0x10] sm:$0xff] %v1001_v9  ;;  %1482 = vrcp.f32 %v976_v11 }
 0x2b2   : > { %v1471_v17 = vpop.eup %1470  ;;  %1016 = vst [vmem:[%s1835_s4] sm:$0xff] %v999_v15  ;;  %1484 = vrcp.f32 %v975_v13  ;;  %v958_v19 = vpop.xlane.xlu1 %957 }
 0x2b3   : > { %v956_v21 = vpop.xlane.xlu0 %955  ;;  %v1473_v23 = vpop.eup %1472  ;;  %v1002_v2 = vmul.f32 %v1471_v17, %v1676_v6  ;;  %v978_v25 = vmax.f32 %v958_v19, 1e-12 }
 0x2b4   : > { %v977_v27 = vmax.f32 %v956_v21, 1e-12  ;;  %v1000_v4 = vmul.f32 %v1473_v23, %v1678_v8 }
 0x2b5   : > { %1019 = vst [vmem:[%s1835_s4 + $0x18] sm:$0xff] %v1002_v2  ;;  %1486 = vrcp.f32 %v978_v25 }
 0x2b6   : > { %v1475_v29 = vpop.eup %1474  ;;  %1017 = vst [vmem:[%s1835_s4 + $0x8] sm:$0xff] %v1000_v4  ;;  %1488 = vrcp.f32 %v977_v27  ;;  %v962_v31 = vpop.xlane.xlu1 %961 }
 0x2b7   : > { %v960_v33 = vpop.xlane.xlu0 %959  ;;  %v1477_v34 = vpop.eup %1476  ;;  %v1004_v6 = vmul.f32 %v1475_v29, %v1686_v16  ;;  %v980_v35 = vmax.f32 %v962_v31, 1e-12 }
 0x2b8   : > { %v979_v36 = vmax.f32 %v960_v33, 1e-12  ;;  %v1003_v8 = vmul.f32 %v1477_v34, %v1682_v12 }
 0x2b9   : > { %1021 = vst [vmem:[%s1835_s4 + $0x28] sm:$0xff] %v1004_v6  ;;  %1490 = vrcp.f32 %v980_v35 }
 0x2ba   : > { %v1479_v37 = vpop.eup %1478  ;;  %1020 = vst [vmem:[%s1835_s4 + $0x20] sm:$0xff] %v1003_v8  ;;  %1492 = vrcp.f32 %v979_v36  ;;  %v966_v38 = vpop.xlane.xlu1 %965 }
 0x2bb   : > { %v964_v39 = vpop.xlane.xlu0 %963  ;;  %v1481_v40 = vpop.eup %1480  ;;  %v1006_v16 = vmul.f32 %v1479_v37, %v1684_v14  ;;  %v982_v41 = vmax.f32 %v966_v38, 1e-12 }
 0x2bc   : > { %v981_v42 = vmax.f32 %v964_v39, 1e-12  ;;  %v1005_v12 = vmul.f32 %v1481_v40, %v1680_v10 }
 0x2bd   : > { %1023 = vst [vmem:[%s1835_s4 + $0x38] sm:$0xff] %v1006_v16  ;;  %1494 = vrcp.f32 %v982_v41 }
 0x2be   : > { %v1483_v43 = vpop.eup %1482  ;;  %1022 = vst [vmem:[%s1835_s4 + $0x30] sm:$0xff] %v1005_v12  ;;  %1496 = vrcp.f32 %v981_v42 }
 0x2bf   : > { %v1485_v44 = vpop.eup %1484  ;;  %v1008_v45 = vmul.f32 %v1483_v43, %v1694_v24 }
 0x2c0   : > { %v1007_v14 = vmul.f32 %v1485_v44, %v1690_v20 }
 0x2c1   : > { %1025 = vst [vmem:[%s1835_s4 + $0x48] sm:$0xff] %v1008_v45 }
 0x2c2   : > { %v1487_v10 = vpop.eup %1486  ;;  %1024 = vst [vmem:[%s1835_s4 + $0x40] sm:$0xff] %v1007_v14 }
 0x2c3   : > { %v1489_v46 = vpop.eup %1488  ;;  %v1010_v47 = vmul.f32 %v1487_v10, %v1692_v22 }
 0x2c4   : > { %v1009_v48 = vmul.f32 %v1489_v46, %v1688_v18 }
 0x2c5   : > { %1027 = vst [vmem:[%s1835_s4 + $0x58] sm:$0xff] %v1010_v47 }
 0x2c6   : > { %v1491_v24 = vpop.eup %1490  ;;  %1026 = vst [vmem:[%s1835_s4 + $0x50] sm:$0xff] %v1009_v48 }
 0x2c7   : > { %v1493_v20 = vpop.eup %1492  ;;  %v1012_v49 = vmul.f32 %v1491_v24, %v1702_v32 }
 0x2c8   : > { %v1011_v50 = vmul.f32 %v1493_v20, %v1698_v28 }
 0x2c9   : > { %1029 = vst [vmem:[%s1835_s4 + $0x68] sm:$0xff] %v1012_v49 }
 0x2ca   : > { %v1495_v22 = vpop.eup %1494  ;;  %1028 = vst [vmem:[%s1835_s4 + $0x60] sm:$0xff] %v1011_v50 }
 0x2cb   : > { %v1497_v18 = vpop.eup %1496  ;;  %v1014_v51 = vmul.f32 %v1495_v22, %v1700_v30 }
 0x2cc   : > { %v1013_v52 = vmul.f32 %v1497_v18, %v1696_v26 }
 0x2cd   : > { %1031 = vst [vmem:[%s1835_s4 + $0x78] sm:$0xff] %v1014_v51 }
 0x2ce   : > { %1030 = vst [vmem:[%s1835_s4 + $0x70] sm:$0xff] %v1013_v52 }
 0x2cf PF: > { %s14_s17 = sadd.s32 1, %s1524_s17   ;;  %s1837_s15 = smov %s1520_s16 }
 0x2d0   : > { %p11_p13 = scmp.ge.s32.totalorder %s14_s17, 5   ;;  %s1838_s16 = smov %s1840_s18 }
 0x2d2   :  { %13 = sbr.rel (!%p11_p13) target bundleno = 2 (0x2), region = 164 }

</bundles_post_ra>
